<compile_context>
chip_gen: v6e
topology: v6e:2x2x1
jax: 0.10.0
libtpu: 0.0.40
codegen_flags: <defaults>
</compile_context>

<pallas_src>
import functools

import jax
import jax.numpy as jnp
from jax import lax
from jax.experimental import pallas as pl
from jax.experimental.pallas import tpu as pltpu


def _round_up(n, m):
    return ((n + m - 1) // m) * m


# ----------------------------------------------------------------------------
# K-tiled linear (final classifier): rows "parallel", contraction "arbitrary"
# ----------------------------------------------------------------------------

def _linear_kernel(x_ref, w_ref, b_ref, o_ref, acc_ref, *, relu):
    k = pl.program_id(1)

    @pl.when(k == 0)
    def _():
        acc_ref[...] = jnp.broadcast_to(b_ref[...], acc_ref.shape)

    acc_ref[...] += jnp.dot(x_ref[...], w_ref[...],
                            preferred_element_type=jnp.float32)

    @pl.when(k == pl.num_programs(1) - 1)
    def _():
        y = acc_ref[...]
        if relu:
            y = jnp.maximum(y, 0.0)
        o_ref[...] = y


def pallas_linear(x, w, b, relu=False, block_rows=512, block_k=512):
    """y = x @ w + b (optionally relu); rows + contraction tiled."""
    n, din = x.shape
    dout = w.shape[1]
    doutp = _round_up(dout, 128)
    tm = min(block_rows, _round_up(n, 8))
    n_pad = _round_up(n, tm)
    tk = min(block_k, _round_up(din, 128))
    din_pad = _round_up(din, tk)
    if n_pad != n or din_pad != din:
        x = jnp.pad(x, ((0, n_pad - n), (0, din_pad - din)))
    if din_pad != din or doutp != dout:
        w = jnp.pad(w, ((0, din_pad - din), (0, doutp - dout)))
    if doutp != dout:
        b = jnp.pad(b, ((0, doutp - dout),))
    out = pl.pallas_call(
        functools.partial(_linear_kernel, relu=relu),
        out_shape=jax.ShapeDtypeStruct((n_pad, doutp), jnp.float32),
        grid=(n_pad // tm, din_pad // tk),
        in_specs=[pl.BlockSpec((tm, tk), lambda i, k: (i, k)),
                  pl.BlockSpec((tk, doutp), lambda i, k: (k, 0)),
                  pl.BlockSpec((1, doutp), lambda i, k: (0, 0))],
        out_specs=pl.BlockSpec((tm, doutp), lambda i, k: (i, 0)),
        scratch_shapes=[pltpu.VMEM((tm, doutp), jnp.float32)],
        compiler_params=pltpu.CompilerParams(
            dimension_semantics=("parallel", "arbitrary")),
    )(x, w, b.reshape(1, doutp))
    return out[:n, :dout]


# ----------------------------------------------------------------------------
# Highway layer (same nn.Linear reused for trans and gate), row tiled
# ----------------------------------------------------------------------------

def _highway_kernel(x_ref, w_ref, b_ref, o_ref):
    x = x_ref[...]
    y = jnp.dot(x, w_ref[...], preferred_element_type=jnp.float32) + b_ref[...]
    gate = jax.nn.sigmoid(y)
    o_ref[...] = gate * jnp.maximum(y, 0.0) + (1.0 - gate) * x


def pallas_highway_layer(x2d, w, b, block_rows=512):
    n, d = x2d.shape
    tm = min(block_rows, _round_up(n, 8))
    n_pad = _round_up(n, tm)
    if n_pad != n:
        x2d = jnp.pad(x2d, ((0, n_pad - n), (0, 0)))
    out = pl.pallas_call(
        _highway_kernel,
        out_shape=jax.ShapeDtypeStruct((n_pad, d), jnp.float32),
        grid=(n_pad // tm,),
        in_specs=[pl.BlockSpec((tm, d), lambda i: (i, 0)),
                  pl.BlockSpec((d, d), lambda i: (0, 0)),
                  pl.BlockSpec((1, d), lambda i: (0, 0))],
        out_specs=pl.BlockSpec((tm, d), lambda i: (i, 0)),
        compiler_params=pltpu.CompilerParams(
            dimension_semantics=("parallel",)),
    )(x2d, w, b.reshape(1, d))
    return out[:n]


# ----------------------------------------------------------------------------
# Char CNN branch: conv(1,KW) + bias + relu + max-pool, lane-dense KW-folded K
# Premise and hypothesis are stacked along the batch dim (one call).
# ----------------------------------------------------------------------------

def _char_conv_kernel(x_ref, w_ref, b_ref, o_ref, *, cemb, kw, t_out):
    # x_ref: (TM, Wlen*Cemb)   w_ref: (KW*Cemb, Coutp)   b_ref: (1, Coutp)
    kc = kw * cemb
    best = None
    for t in range(t_out):
        window = x_ref[:, pl.ds(t * cemb, kc)]            # contiguous lanes
        y = jnp.dot(window, w_ref[...], preferred_element_type=jnp.float32)
        y = jnp.maximum(y + b_ref[...], 0.0)
        best = y if best is None else jnp.maximum(best, y)
    o_ref[...] = best


def pallas_char_conv(char_ids_2b, char_table, conv_w, conv_b, L,
                     block_rows=512):
    """char_ids_2b: (2B, L, Wlen) -> (2B, L, Cout) char features."""
    two_b, _, wlen = char_ids_2b.shape
    cemb = char_table.shape[1]
    cout, _, _, kw = conv_w.shape
    t_out = wlen - kw + 1

    emb = jnp.take(char_table, char_ids_2b.reshape(-1, wlen), axis=0)
    # reference raw .view(bs, -1, seq_len, word_len) (memory reinterpretation)
    x_nchw = emb.reshape(two_b, cemb, L, wlen)
    # channel-last rows folded to a lane-dense (Wlen*Cemb) layout
    x_rows = jnp.transpose(x_nchw, (0, 2, 3, 1)).reshape(two_b * L, wlen * cemb)

    coutp = _round_up(cout, 128)
    # Wfold[k*Cemb + c, o] = conv_w[o, c, 0, k]
    w_fold = jnp.transpose(conv_w[:, :, 0, :], (2, 1, 0)).reshape(kw * cemb, cout)
    w_fold = jnp.pad(w_fold, ((0, 0), (0, coutp - cout)))
    b_pad = jnp.pad(conv_b, ((0, coutp - cout),)).reshape(1, coutp)

    rows = two_b * L
    tm = min(block_rows, _round_up(rows, 8))
    rows_pad = _round_up(rows, tm)
    if rows_pad != rows:
        x_rows = jnp.pad(x_rows, ((0, rows_pad - rows), (0, 0)))

    out = pl.pallas_call(
        functools.partial(_char_conv_kernel, cemb=cemb, kw=kw, t_out=t_out),
        out_shape=jax.ShapeDtypeStruct((rows_pad, coutp), jnp.float32),
        grid=(rows_pad // tm,),
        in_specs=[pl.BlockSpec((tm, wlen * cemb), lambda i: (i, 0)),
                  pl.BlockSpec((kw * cemb, coutp), lambda i: (0, 0)),
                  pl.BlockSpec((1, coutp), lambda i: (0, 0))],
        out_specs=pl.BlockSpec((tm, coutp), lambda i: (i, 0)),
        compiler_params=pltpu.CompilerParams(
            dimension_semantics=("parallel",)),
    )(x_rows, w_fold, b_pad)

    y = out[:rows, :cout].reshape(two_b, L, cout)
    # reference: (B, Cout, L) contiguous then raw .view(-1, seq_len, char_out)
    y = jnp.transpose(y, (0, 2, 1)).reshape(two_b, L, cout)
    return y


# ----------------------------------------------------------------------------
# Fused self-attention + fuse-gate accumulation.
#   grid = (stream=2 "parallel", batch "arbitrary")
#   Per (s, k): compute tri-linear self-attention for batch k of stream s and
#   immediately accumulate lhs@W1 + att@W2 (and W3/W4) into the batch-summed
#   (L, D) z/f pre-activations (the reference flattens (L, B*D) @ (B*D, D)).
# ----------------------------------------------------------------------------

def _sa_fuse_acc_kernel(p_ref, m_ref, w1_ref, w2_ref, w3_ref, sb_ref,
                        fg1_ref, fg2_ref, fg3_ref, fg4_ref,
                        zb_ref, fb_ref, z_ref, f_ref):
    k = pl.program_id(1)

    @pl.when(k == 0)
    def _():
        z_ref[0] = jnp.broadcast_to(zb_ref[0], z_ref.shape[1:])
        f_ref[0] = jnp.broadcast_to(fb_ref[0], f_ref.shape[1:])

    p = p_ref[0, 0]                                                 # (L, D)
    m = m_ref[0]                                                    # (L, L)

    # --- tri-linear self-attention (w1.p_i + w2.p_j + w3.(p_i*p_j) + b) ----
    s1 = jnp.sum(p * w1_ref[0], axis=-1, keepdims=True)             # (L, 1)
    s2 = jnp.sum(p * w2_ref[0], axis=-1, keepdims=True)             # (L, 1)
    cross = lax.dot_general(p * w3_ref[0], p,
                            dimension_numbers=(((1,), (1,)), ((), ())),
                            preferred_element_type=jnp.float32)     # (L, L)
    logits = s1 + s2.T + cross + sb_ref[0]
    logits = logits + (1.0 - m) * (-1e30)                           # exp_mask
    mx = jnp.max(logits, axis=-1, keepdims=True)
    e = jnp.exp(logits - mx)
    a = e * pl.reciprocal(jnp.sum(e, axis=-1, keepdims=True), approx=True)
    att = jnp.dot(a, p, preferred_element_type=jnp.float32)         # softsel

    # --- fuse-gate batch-slab contraction (bf16 MXU operands, f32 acc) ----
    lh = p.astype(jnp.bfloat16)
    rh = att.astype(jnp.bfloat16)
    z_ref[0] = z_ref[0] + (
        jnp.dot(lh, fg1_ref[0], preferred_element_type=jnp.float32)
        + jnp.dot(rh, fg2_ref[0], preferred_element_type=jnp.float32))
    f_ref[0] = f_ref[0] + (
        jnp.dot(lh, fg3_ref[0], preferred_element_type=jnp.float32)
        + jnp.dot(rh, fg4_ref[0], preferred_element_type=jnp.float32))


def _fuse_gate_apply_kernel(p_ref, z_ref, f_ref, o_ref):
    z = jnp.tanh(z_ref[0])                  # self_att_fuse_gate_relu_z = False
    f = jax.nn.sigmoid(f_ref[0])
    # two_gate_fuse_gate = False; z/f broadcast over the batch (reference)
    o_ref[0, 0] = f * p_ref[0, 0] + (1.0 - f) * z


def pallas_encoder_layer(p_stack, self_mask, enc):
    """p_stack: (2, B, L, D) premise/hypothesis stack -> updated stack."""
    S, B, L, D = p_stack.shape

    z_sum, f_sum = pl.pallas_call(
        _sa_fuse_acc_kernel,
        out_shape=(jax.ShapeDtypeStruct((S, L, D), jnp.float32),
                   jax.ShapeDtypeStruct((S, L, D), jnp.float32)),
        grid=(S, B),
        in_specs=[
            pl.BlockSpec((1, 1, L, D), lambda s, k: (s, k, 0, 0)),   # p
            pl.BlockSpec((1, L, L), lambda s, k: (k, 0, 0)),         # mask
            pl.BlockSpec((1, 1, D), lambda s, k: (s, 0, 0)),         # w1
            pl.BlockSpec((1, 1, D), lambda s, k: (s, 0, 0)),         # w2
            pl.BlockSpec((1, 1, D), lambda s, k: (s, 0, 0)),         # w3
            pl.BlockSpec((1, 1, 1), lambda s, k: (s, 0, 0)),         # sa bias
            pl.BlockSpec((1, D, D), lambda s, k: (s, k, 0)),         # fg W1
            pl.BlockSpec((1, D, D), lambda s, k: (s, k, 0)),         # fg W2
            pl.BlockSpec((1, D, D), lambda s, k: (s, k, 0)),         # fg W3
            pl.BlockSpec((1, D, D), lambda s, k: (s, k, 0)),         # fg W4
            pl.BlockSpec((1, 1, D), lambda s, k: (s, 0, 0)),         # b1+b2
            pl.BlockSpec((1, 1, D), lambda s, k: (s, 0, 0)),         # b3+b4
        ],
        out_specs=(pl.BlockSpec((1, L, D), lambda s, k: (s, 0, 0)),
                   pl.BlockSpec((1, L, D), lambda s, k: (s, 0, 0))),
        compiler_params=pltpu.CompilerParams(
            dimension_semantics=("parallel", "arbitrary")),
    )(p_stack, self_mask, enc["w1"], enc["w2"], enc["w3"], enc["sb"],
      enc["fg1"], enc["fg2"], enc["fg3"], enc["fg4"], enc["zb"], enc["fb"])

    p_new = pl.pallas_call(
        _fuse_gate_apply_kernel,
        out_shape=jax.ShapeDtypeStruct((S, B, L, D), jnp.float32),
        grid=(S, B),
        in_specs=[pl.BlockSpec((1, 1, L, D), lambda s, k: (s, k, 0, 0)),
                  pl.BlockSpec((1, L, D), lambda s, k: (s, 0, 0)),
                  pl.BlockSpec((1, L, D), lambda s, k: (s, 0, 0))],
        out_specs=pl.BlockSpec((1, 1, L, D), lambda s, k: (s, k, 0, 0)),
        compiler_params=pltpu.CompilerParams(
            dimension_semantics=("parallel", "parallel")),
    )(p_stack, z_sum, f_sum)
    return p_new


def _build_encoder_params(params, B, D):
    def split_sa(w):
        return (w[:D, 0][None, :], w[D:2 * D, 0][None, :], w[2 * D:, 0][None, :])

    p1, p2, p3 = split_sa(params["sa_p_w"])
    h1, h2, h3 = split_sa(params["sa_h_w"])
    enc = {
        "w1": jnp.stack([p1, h1]),                                   # (2,1,D)
        "w2": jnp.stack([p2, h2]),
        "w3": jnp.stack([p3, h3]),
        "sb": jnp.stack([params["sa_p_b"], params["sa_h_b"]]).reshape(2, 1, 1),
        "zb": jnp.stack([params["fg_p1_b"] + params["fg_p2_b"],
                         params["fg_h1_b"] + params["fg_h2_b"]]).reshape(2, 1, D),
        "fb": jnp.stack([params["fg_p3_b"] + params["fg_p4_b"],
                         params["fg_h3_b"] + params["fg_h4_b"]]).reshape(2, 1, D),
    }
    for i in range(1, 5):
        enc[f"fg{i}"] = jnp.stack(
            [params[f"fg_p{i}_w"], params[f"fg_h{i}_w"]]).astype(jnp.bfloat16)
    return enc


# ----------------------------------------------------------------------------
# Interaction 1x1 conv on the channel-view (B, D, L*L) bi-attention tensor
# ----------------------------------------------------------------------------

def _interaction_kernel(x_ref, w_ref, b_ref, o_ref):
    # x_ref: (1, D, L*L) bf16,  w_ref: (D2, D) bf16 -> f32 accumulate
    y = jnp.dot(w_ref[...], x_ref[0],
                preferred_element_type=jnp.float32) + b_ref[...]
    o_ref[0] = jnp.maximum(y, 0.0)                # first_scale_down_layer_relu


def pallas_interaction_conv(bi_view_bf16, w2d_bf16, b):
    B, D, LL = bi_view_bf16.shape
    D2 = w2d_bf16.shape[0]
    return pl.pallas_call(
        _interaction_kernel,
        out_shape=jax.ShapeDtypeStruct((B, D2, LL), jnp.float32),
        grid=(B,),
        in_specs=[pl.BlockSpec((1, D, LL), lambda bi: (bi, 0, 0)),
                  pl.BlockSpec((D2, D), lambda bi: (0, 0)),
                  pl.BlockSpec((D2, 1), lambda bi: (0, 0))],
        out_specs=pl.BlockSpec((1, D2, LL), lambda bi: (bi, 0, 0)),
        compiler_params=pltpu.CompilerParams(
            dimension_semantics=("parallel",)),
    )(bi_view_bf16, w2d_bf16, b.reshape(D2, 1))


# ----------------------------------------------------------------------------
# DIIN forward
# ----------------------------------------------------------------------------

def diin_forward(params, inputs, cfg):
    (premise_x, hypothesis_x, pre_pos, hyp_pos,
     premise_char, hypothesis_char, premise_em, hypothesis_em) = inputs
    B, L = premise_x.shape

    # blocks.length: mask of non-padding tokens (helper not in the reference)
    prem_mask = (premise_x != 0).astype(jnp.float32)                 # (B, L)

    premise_in = jnp.take(params["word_emb"], premise_x, axis=0)
    hypothesis_in = jnp.take(params["word_emb"], hypothesis_x, axis=0)

    # fused char CNN branch (premise + hypothesis in one call)
    char_all = jnp.concatenate([premise_char, hypothesis_char], axis=0)
    conv_all = pallas_char_conv(char_all, params["char_emb"],
                                params["char_cnn_w"], params["char_cnn_b"], L)
    conv_pre, conv_hyp = conv_all[:B], conv_all[B:]

    premise_in = jnp.concatenate(
        [premise_in, conv_pre, pre_pos, premise_em[..., None]], axis=2)
    hypothesis_in = jnp.concatenate(
        [hypothesis_in, conv_hyp, hyp_pos, hypothesis_em[..., None]], axis=2)
    D = premise_in.shape[-1]

    # highway network: premise + hypothesis merged into one row-tiled call
    x2d = jnp.concatenate([premise_in.reshape(B * L, D),
                           hypothesis_in.reshape(B * L, D)], axis=0)
    for _ in range(cfg["highway_num_layers"]):
        x2d = pallas_highway_layer(x2d, params["hw_w"], params["hw_b"])
    premise_in = x2d[:B * L].reshape(B, L, D)
    hypothesis_in = x2d[B * L:].reshape(B, L, D)

    # self-attention encoder: both streams stacked; attention is fused into
    # the fuse-gate reduction, gate applied in a fully parallel second pass.
    p_stack = jnp.stack([premise_in, hypothesis_in])                  # (2,B,L,D)
    # reference passes prem_mask for both streams
    self_mask = prem_mask[:, :, None] * prem_mask[:, None, :]         # (B,L,L)
    enc = _build_encoder_params(params, B, D)
    for _ in range(cfg["self_att_enc_layers"]):
        p_stack = pallas_encoder_layer(p_stack, self_mask, enc)
    pre, hyp = p_stack[0], p_stack[1]

    # bi-attention product + torch raw-.view scramble: one fused XLA op that
    # writes the channel-view (B, D, L*L) tensor once (bf16, half traffic);
    # the Pallas 1x1-conv kernel reads it once.
    # TODO(synk): keeping the product in VMEM and fusing it with the 1x1 conv
    # needs the lane-dim reshape implied by torch's raw .view, which Mosaic
    # cannot lower; the scramble is therefore done by a single fused XLA copy.
    bi_view = (pre[:, :, None, :] * hyp[:, None, :, :]).reshape(
        B, D, L * L).astype(jnp.bfloat16)

    D2 = params["int_w"].shape[0]
    w_int = params["int_w"].reshape(D2, D).astype(jnp.bfloat16)
    fm = pallas_interaction_conv(bi_view, w_int, params["int_b"])     # (B,D2,L*L)

    # TODO(synk): DenseNet class is not provided in the reference file; the
    # feature map is flattened directly into the final classifier instead.
    premise_final = fm.reshape(B, D2 * L * L)                         # NCHW flatten

    logits = pallas_linear(premise_final, params["final_w"], params["final_b"])
    return logits


# ----------------------------------------------------------------------------
# Deterministic parameter init (synthetic, scaled-down DIIN)
# ----------------------------------------------------------------------------

def init_params(key, vocab, char_vocab, E, Cemb, Cout, KW, pos_dim, B, L, D2,
                n_cls=3):
    D = E + Cout + pos_dim + 1
    keys = jax.random.split(key, 32)

    def nrm(k, shape, s=0.05):
        return jax.random.normal(k, shape, dtype=jnp.float32) * s

    p = {}
    word = nrm(keys[0], (vocab, E), 0.1)
    p["word_emb"] = word.at[0].set(0.0)                    # padding_idx = 0
    p["char_emb"] = nrm(keys[1], (char_vocab, Cemb), 0.1)
    p["char_cnn_w"] = nrm(keys[2], (Cout, Cemb, 1, KW))
    p["char_cnn_b"] = nrm(keys[3], (Cout,))
    p["hw_w"] = nrm(keys[4], (D, D))
    p["hw_b"] = nrm(keys[5], (D,))
    p["sa_p_w"] = nrm(keys[6], (3 * D, 1))
    p["sa_p_b"] = nrm(keys[7], (1,))
    p["sa_h_w"] = nrm(keys[8], (3 * D, 1))
    p["sa_h_b"] = nrm(keys[9], (1,))
    ki = 10
    for s in ("p", "h"):
        for i in range(1, 5):
            p[f"fg_{s}{i}_w"] = nrm(keys[ki], (B * D, D)); ki += 1
            p[f"fg_{s}{i}_b"] = nrm(keys[ki], (D,)); ki += 1
    p["int_w"] = nrm(keys[26], (D2, D, 1, 1))
    p["int_b"] = nrm(keys[27], (D2,))
    p["final_w"] = nrm(keys[28], (D2 * L * L, n_cls))
    p["final_b"] = nrm(keys[29], (n_cls,))
    return p, D


# ----------------------------------------------------------------------------
# Main
# ----------------------------------------------------------------------------

if __name__ == "__main__":
    key = jax.random.PRNGKey(0)
    B, L, Wlen = 2, 8, 6
    E, Cemb, Cout, KW, pos_dim, D2 = 16, 8, 8, 5, 7, 16
    vocab, char_vocab = 50, 30

    kp, kh, kc1, kc2, kpp, khp, ke1, ke2, kw = jax.random.split(key, 9)
    premise_x = jax.random.randint(kp, (B, L), 1, vocab, dtype=jnp.int32)
    hypothesis_x = jax.random.randint(kh, (B, L), 1, vocab, dtype=jnp.int32)
    premise_x = premise_x.at[0, -1].set(0)                 # padding, exercises mask
    hypothesis_x = hypothesis_x.at[1, -2:].set(0)
    premise_char = jax.random.randint(kc1, (B, L, Wlen), 0, char_vocab,
                                      dtype=jnp.int32)
    hypothesis_char = jax.random.randint(kc2, (B, L, Wlen), 0, char_vocab,
                                         dtype=jnp.int32)
    pre_pos = jax.random.normal(kpp, (B, L, pos_dim), dtype=jnp.float32)
    hyp_pos = jax.random.normal(khp, (B, L, pos_dim), dtype=jnp.float32)
    premise_em = (jax.random.uniform(ke1, (B, L)) > 0.5).astype(jnp.float32)
    hypothesis_em = (jax.random.uniform(ke2, (B, L)) > 0.5).astype(jnp.float32)

    params, D = init_params(kw, vocab, char_vocab, E, Cemb, Cout, KW,
                            pos_dim, B, L, D2)

    cfg = dict(highway_num_layers=1, self_att_enc_layers=1)

    inputs = (premise_x, hypothesis_x, pre_pos, hyp_pos,
              premise_char, hypothesis_char, premise_em, hypothesis_em)

    logits = diin_forward(params, inputs, cfg)
    jax.block_until_ready(logits)
    assert logits.shape == (B, 3) and logits.dtype == jnp.float32
    print("KERNEL_OK")
</pallas_src>

<mosaic_0001>
module attributes {stable_mosaic.version = 11 : i64} {
  func.func @_char_conv_kernel(%arg0: i32, %arg1: memref<32x48xf32, #tpu.memory_space<vmem>>, %arg2: memref<40x128xf32, #tpu.memory_space<vmem>>, %arg3: memref<1x128xf32, #tpu.memory_space<vmem>>, %arg4: memref<32x128xf32, #tpu.memory_space<vmem>>) attributes {dimension_semantics = [#tpu.dimension_semantics<parallel>], iteration_bounds = array<i64: 1>, scalar_prefetch = 0 : i64, scratch_operands = 0 : i64, tpu.core_type = #tpu.core_type<tc>, window_params = [{transform_indices = @transform_0, window_bounds = array<i64: 32, 48>}, {pipeline_mode = #tpu.pipeline_mode<synchronous>, transform_indices = @transform_1, window_bounds = array<i64: 40, 128>}, {pipeline_mode = #tpu.pipeline_mode<synchronous>, transform_indices = @transform_2, window_bounds = array<i64: 1, 128>}, {transform_indices = @transform_3, window_bounds = array<i64: 32, 128>}]} {
    %c0 = arith.constant 0 : index
    %c0_0 = arith.constant 0 : index
    %0 = vector.load %arg1[%c0, %c0_0] : memref<32x48xf32, #tpu.memory_space<vmem>>, vector<32x40xf32>
    %c0_1 = arith.constant 0 : index
    %c0_2 = arith.constant 0 : index
    %1 = vector.load %arg2[%c0_1, %c0_2] : memref<40x128xf32, #tpu.memory_space<vmem>>, vector<40x128xf32>
    %cst = arith.constant dense<0.000000e+00> : vector<32x128xf32>
    %2 = tpu.matmul %0, %1, %cst {dimension_numbers = #tpu.dot_dimension_numbers<[1], [0], [0], [1], [0, 0, 1, 1], [], []>} : vector<32x40xf32>, vector<40x128xf32>, vector<32x128xf32> -> vector<32x128xf32>
    %c0_3 = arith.constant 0 : index
    %c0_4 = arith.constant 0 : index
    %3 = vector.load %arg3[%c0_3, %c0_4] : memref<1x128xf32, #tpu.memory_space<vmem>>, vector<1x128xf32>
    %4 = vector.broadcast %3 : vector<1x128xf32> to vector<32x128xf32>
    %5 = arith.addf %2, %4 : vector<32x128xf32>
    %cst_5 = arith.constant 0.000000e+00 : f32
    %6 = vector.broadcast %cst_5 : f32 to vector<32x128xf32>
    %7 = arith.maximumf %5, %6 : vector<32x128xf32>
    %c0_6 = arith.constant 0 : index
    %c8 = arith.constant 8 : index
    %8 = vector.load %arg1[%c0_6, %c8] : memref<32x48xf32, #tpu.memory_space<vmem>>, vector<32x40xf32>
    %c0_7 = arith.constant 0 : index
    %c0_8 = arith.constant 0 : index
    %9 = vector.load %arg2[%c0_7, %c0_8] : memref<40x128xf32, #tpu.memory_space<vmem>>, vector<40x128xf32>
    %cst_9 = arith.constant dense<0.000000e+00> : vector<32x128xf32>
    %10 = tpu.matmul %8, %9, %cst_9 {dimension_numbers = #tpu.dot_dimension_numbers<[1], [0], [0], [1], [0, 0, 1, 1], [], []>} : vector<32x40xf32>, vector<40x128xf32>, vector<32x128xf32> -> vector<32x128xf32>
    %c0_10 = arith.constant 0 : index
    %c0_11 = arith.constant 0 : index
    %11 = vector.load %arg3[%c0_10, %c0_11] : memref<1x128xf32, #tpu.memory_space<vmem>>, vector<1x128xf32>
    %12 = vector.broadcast %11 : vector<1x128xf32> to vector<32x128xf32>
    %13 = arith.addf %10, %12 : vector<32x128xf32>
    %cst_12 = arith.constant 0.000000e+00 : f32
    %14 = vector.broadcast %cst_12 : f32 to vector<32x128xf32>
    %15 = arith.maximumf %13, %14 : vector<32x128xf32>
    %16 = arith.maximumf %7, %15 : vector<32x128xf32>
    %c0_13 = arith.constant 0 : index
    %c0_14 = arith.constant 0 : index
    %17 = vector.load %arg4[%c0_13, %c0_14] : memref<32x128xf32, #tpu.memory_space<vmem>>, vector<32x128xf32>
    tpu.vector_store %arg4[%c0_13, %c0_14], %16 {strides = array<i32>} : memref<32x128xf32, #tpu.memory_space<vmem>>, vector<32x128xf32>,
    return
  }
  func.func @transform_0(%arg0: i32) -> (i32, i32) {
    %c0_i32 = arith.constant 0 : i32
    %c0_i32_0 = arith.constant 0 : i32
    return %arg0, %c0_i32 : i32, i32
  }
  func.func @transform_1(%arg0: i32) -> (i32, i32) {
    %c0_i32 = arith.constant 0 : i32
    %c0_i32_0 = arith.constant 0 : i32
    %c0_i32_1 = arith.constant 0 : i32
    return %c0_i32, %c0_i32_0 : i32, i32
  }
  func.func @transform_2(%arg0: i32) -> (i32, i32) {
    %c0_i32 = arith.constant 0 : i32
    %c0_i32_0 = arith.constant 0 : i32
    %c0_i32_1 = arith.constant 0 : i32
    return %c0_i32, %c0_i32_0 : i32, i32
  }
  func.func @transform_3(%arg0: i32) -> (i32, i32) {
    %c0_i32 = arith.constant 0 : i32
    %c0_i32_0 = arith.constant 0 : i32
    return %arg0, %c0_i32 : i32, i32
  }
}

</mosaic_0001>

<bundles_post_ra>
// kernel: tpu_custom_call.1
= control target key start
LH: loop header
LB: loop body
LE: loop exit
PB: predicated region body
PF: predicated region fallthrough
CT: control target
= control target key end

     0   :  { %8 = vsyncpa [#allocation3], 0  ;;  %s478_s0 = inlined_call_operand.hbm [shape: f32[32,48], index: 0, kind: input, shape index: {}]   ;;  %s479_s1 = inlined_call_operand.hbm [shape: f32[40,128], index: 1, kind: input, shape index: {}]   ;;  %s480_s2 = inlined_call_operand.vmem [shape: f32[1,128], index: 2, kind: input, shape index: {}]   ;;  %s481_s3 = inlined_call_operand.hbm [shape: f32[32,128], index: 3, kind: output, shape index: {}]  }
   0x1   :  { %9 = vsyncpa [#allocation6], 0 }
   0x2   :  { %10 = vsyncpa [#allocation4], 0  ;;  %s423_s12 = smov [#allocation2]  }
   0x3   :  { %s16_s13 = sshll.u32 %s423_s12, 4  ;;  %s17_s13 = int_to_ptr.vmem [resolvable:$true] %s16_s13 }
   0x4   :  { %s365_s14 = scalar_lea.vmem %s17_s13, 512  ;;  %p370_p1 = scmp.lt.s32.totalorder %s17_s13, %s17_s13 }
   0x5   :  { %p366_p0 = scmp.ne.s32.totalorder %s17_s13, %s365_s14  ;;  %p371_p2 = scmp.lt.s32.totalorder %s365_s14, %s365_s14 }
   0x7   :  { %p372_p3 = por %p371_p2, %p370_p1 }
   0x9   :  { %p373_p4 = pnand %p372_p3, %p366_p0 }
   0xb   :  { %376 = shalt.err (!%p373_p4)
}
   0xc   :  { %s424_s15 = smov 128   ;;  %s425_s16 = smov 8  }
   0xd   :  { %22 = dma.hbm_to_vmem [thread:$0]  %s478_s0, 512, %s17_s13, [#allocation3], %s424_s15, %s424_s15, %s425_s16  }
   0xe   :  { %s426_s19 = smov [#allocation5]  }
   0xf   :  { %s28_s20 = sshll.u32 %s426_s19, 4  ;;  %s29_s20 = int_to_ptr.vmem [resolvable:$true] %s28_s20 }
  0x10   :  { %s385_s21 = scalar_lea.vmem %s29_s20, 640  ;;  %p390_p6 = scmp.lt.s32.totalorder %s29_s20, %s29_s20 }
  0x11   :  { %p386_p5 = scmp.ne.s32.totalorder %s29_s20, %s385_s21  ;;  %p391_p7 = scmp.lt.s32.totalorder %s385_s21, %s385_s21 }
  0x13   :  { %p392_p8 = por %p391_p7, %p390_p6 }
  0x15   :  { %p393_p9 = pnand %p392_p8, %p386_p5 }
  0x17   :  { %396 = shalt.err (!%p393_p9)
}
  0x18   :  { %34 = dma.hbm_to_vmem [thread:$0]  %s479_s1, 640, %s29_s20, [#allocation6], %s424_s15, %s424_s15, %s425_s16  }
  0x19   :  { %417 = dma.done.wait [#allocation3], 512  }
  0x1a   :  { %418 = vsyncadd [#allocation3], 4294966784 }
  0x1b   :  { %419 = dma.done.wait [#allocation6], 640  }
  0x1c   :  { %420 = vsyncadd [#allocation6], 4294966656  ;;  %v43_v0 = vld [vmem:[#allocation2] sm:$0xff]  ;;  %v45_v1 = vld [vmem:[#allocation2 + $0x10] sm:$0xff]  ;;  %s427_s0 = smov 120   ;;  %vm59_vm0 = vcmask 326656  }
  0x1d   :  { %161 = vrot.lane.b32.xlu0 %v43_v0, %s427_s0  ;;  %165 = vrot.lane.b32.xlu1 %v45_v1, %s427_s0  ;;  %v51_v2 = vld [vmem:[#allocation5 + $0x20] sm:$0xff]  ;;  %v50_v3 = vld [vmem:[#allocation5 + $0x18] sm:$0xff]  ;;  %v44_v4 = vld [vmem:[#allocation2 + $0x8] sm:$0xff] }
  0x1e   :  { %v46_v5 = vld [vmem:[#allocation2 + $0x18] sm:$0xff]  ;;  %319 = vmatprep.subr.mxu0 %v51_v2  ;;  %335 = vmatprep.subr.mxu1 %v51_v2  ;;  %v49_v6 = vld [vmem:[#allocation5 + $0x10] sm:$0xff]  ;;  %v48_v7 = vld [vmem:[#allocation5 + $0x8] sm:$0xff] }
  0x1f   :  { %320 = vmatpush3.msra.mxu0 %v51_v2  ;;  %336 = vmatpush3.msra.mxu1 %v51_v2  ;;  %v47_v8 = vld [vmem:[#allocation5] sm:$0xff] }
  0x20   :  { %321 = vmatprep.subr.mxu0 %v50_v3  ;;  %337 = vmatprep.subr.mxu1 %v50_v3  ;;  %v292_v14 = vld [vmem:[%s480_s2] ss:$0 sm:$0xff]  ;;  %s428_s2 = smov [#allocation7]  }
  0x21   :  { %163 = vrot.lane.b32.xlu0 %v44_v4, %s427_s0  ;;  %167 = vrot.lane.b32.xlu1 %v46_v5, %s427_s0  ;;  %s279_s25 = sshll.u32 %s428_s2, 4  ;;  %s280_s25 = int_to_ptr.vmem [resolvable:$true] %s279_s25 }
  0x22   :  { %322 = vmatpush3.msra.mxu0 %v50_v3  ;;  %338 = vmatpush3.msra.mxu1 %v50_v3  ;;  %s397_s26 = scalar_lea.vmem %s280_s25, 512  ;;  %p402_p11 = scmp.lt.s32.totalorder %s280_s25, %s280_s25 }
  0x23   :  { %323 = vmatprep.subr.mxu0 %v49_v6  ;;  %339 = vmatprep.subr.mxu1 %v49_v6  ;;  %p398_p10 = scmp.ne.s32.totalorder %s280_s25, %s397_s26  ;;  %p403_p12 = scmp.lt.s32.totalorder %s397_s26, %s397_s26 }
  0x24   :  { %324 = vmatpush3.msra.mxu0 %v49_v6  ;;  %340 = vmatpush3.msra.mxu1 %v49_v6 }
  0x25   :  { %325 = vmatprep.subr.mxu0 %v48_v7  ;;  %341 = vmatprep.subr.mxu1 %v48_v7  ;;  %p404_p13 = por %p403_p12, %p402_p11 }
  0x26   :  { %326 = vmatpush3.msra.mxu0 %v48_v7  ;;  %329 = vmatprep.mubr.msk.f32.mxu0 %vm59_vm0, %v43_v0 }
  0x27   :  { %327 = vmatprep.subr.mxu0 %v47_v8  ;;  %342 = vmatpush3.msra.mxu1 %v48_v7  ;;  %p405_p0 = pnand %p404_p13, %p398_p10 }
  0x28   :  { %328 = vmatpush3.msra.mxu0 %v47_v8  ;;  %343 = vmatprep.subr.mxu1 %v47_v8 }
  0x29   :  { %330 = vmatmul.mubr.msk.f32.vlgmr.msra.gmra.mxu0 %vm59_vm0, %v44_v4  ;;  %344 = vmatpush3.msra.mxu1 %v47_v8 }
  0x2a   :  { %332 = vmatprep.mubr.msk.f32.mxu0 %vm59_vm0, %v45_v1 }
  0x2d   :  { %333 = vmatmul.mubr.msk.f32.gmra.mxu0 %vm59_vm0, %v46_v5 }
  0x8f   :  { %v162_v9 = vpop.permute.xlu0 %161  ;;  %v166_v10 = vpop.permute.xlu1 %165 }
  0x90   :  { %345 = vmatprep.mubr.msk.f32.mxu1 %vm59_vm0, %v162_v9 }
  0x93   :  { %v164_v11 = vpop.permute.xlu0 %163  ;;  %v168_v12 = vpop.permute.xlu1 %167 }
  0x94   :  { %346 = vmatmul.mubr.msk.f32.vlgmr.msra.gmra.mxu1 %vm59_vm0, %v164_v11 }
  0x95   :  { %348 = vmatprep.mubr.msk.f32.mxu1 %vm59_vm0, %v166_v10 }
  0x98   :  { %349 = vmatmul.mubr.msk.f32.gmra.mxu1 %vm59_vm0, %v168_v12 }
  0xe9   :  { %v331_v13 = vpop.f32.mrf.mxu0 }
  0xea   :  { %v144_v16 = vadd.f32 %v331_v13, %v292_v14 }
  0xeb   :  { %v138_v15 = vpop.f32.mrf.mxu0 }
  0xec   :  { %v139_v18 = vadd.f32 %v292_v14, %v138_v15  ;;  %v158_v21 = vmax.f32 %v144_v16, 0.0 }
  0xed   :  { %v334_v17 = vpop.f32.mrf.mxu0 }
  0xee   :  { %v154_v20 = vadd.f32 %v334_v17, %v292_v14  ;;  %v157_v27 = vmax.f32 %v139_v18, 0.0 }
  0xef   :  { %v148_v24 = vpop.f32.mrf.mxu0 }
  0xf0   :  { %v160_v28 = vmax.f32 %v154_v20, 0.0  ;;  %v149_v32 = vadd.f32 %v292_v14, %v148_v24 }
  0xf2   :  { %v159_v38 = vmax.f32 %v149_v32, 0.0 }
 0x154   :  { %v347_v19 = vpop.f32.mrf.mxu1 }
 0x155   :  { %v249_v22 = vadd.f32 %v347_v19, %v292_v14 }
 0x156   :  { %v243_v23 = vpop.f32.mrf.mxu1 }
 0x157   :  { %v263_v25 = vmax.f32 %v249_v22, 0.0  ;;  %v244_v26 = vadd.f32 %v292_v14, %v243_v23 }
 0x158   :  { %v350_v29 = vpop.f32.mrf.mxu1 }
 0x159   :  { %v267_v30 = vmax.f32 %v158_v21, %v263_v25  ;;  %v262_v31 = vmax.f32 %v244_v26, 0.0  ;;  %v259_v33 = vadd.f32 %v350_v29, %v292_v14 }
 0x15a   :  { %v253_v34 = vpop.f32.mrf.mxu1 }
 0x15b   :  { %271 = vst [vmem:[#allocation7 + $0x8] sm:$0xff] %v267_v30  ;;  %v266_v35 = vmax.f32 %v157_v27, %v262_v31  ;;  %v265_v36 = vmax.f32 %v259_v33, 0.0  ;;  %v254_v37 = vadd.f32 %v292_v14, %v253_v34 }
 0x15d   :  { %270 = vst [vmem:[#allocation7] sm:$0xff] %v266_v35  ;;  %v269_v39 = vmax.f32 %v160_v28, %v265_v36  ;;  %v264_v40 = vmax.f32 %v254_v37, 0.0 }
 0x15f   :  { %273 = vst [vmem:[#allocation7 + $0x18] sm:$0xff] %v269_v39  ;;  %v268_v41 = vmax.f32 %v159_v38, %v264_v40 }
 0x161   :  { %272 = vst [vmem:[#allocation7 + $0x10] sm:$0xff] %v268_v41 }
 0x162   :  { %408 = shalt.err (!%p405_p0)
}
 0x163   :  { %285 = dma.vmem_to_hbm [thread:$0]  %s280_s25, 512, %s481_s3, [#allocation4], %s424_s15, %s424_s15, %s425_s16  }
 0x164   :  { %421 = dma.done.wait [#allocation4], 512  }
 0x165   :  { %422 = vsyncadd [#allocation4], 4294966784 }
 0x166   :  { %289 = vsyncpa [#allocation3], 1 }
 0x167   :  { %290 = vsyncpa [#allocation6], 1 }
 0x168   :  { %291 = vsyncpa [#allocation4], 1 }

</bundles_post_ra>
